<compile_context>
chip_gen: v5e
topology: v5e:2x2
jax: 0.10.0
libtpu: 0.0.40
codegen_flags: <defaults>
</compile_context>

<pallas_src>
import jax
import jax.numpy as jnp
from jax.experimental import pallas as pl
from jax.experimental.pallas import tpu as pltpu

LANE = 128


def _round_up(a: int, b: int) -> int:
    return ((a + b - 1) // b) * b


def _choose_tm(mp: int, tm_max: int) -> int:
    """Balanced row-tile size: multiple of 8, >=4 steps when possible, <= tm_max."""
    if mp <= 8:
        return mp                              # single block == full (small) array
    nsteps = max(pl.cdiv(mp, tm_max), 4)       # >=4 steps: 2 TCs + pipeline overlap
    nsteps = min(nsteps, pl.cdiv(mp, 8))       # but never tiles smaller than 8 rows
    return _round_up(pl.cdiv(mp, nsteps), 8)


def ffn_kernel(x_ref, w1_ref, b1_ref, w2_ref, b2_ref, o_ref):
    x = x_ref[...]
    xb = x.astype(jnp.bfloat16)                # MXU operands in bf16, f32 accumulate
    h = jnp.dot(xb, w1_ref[...], preferred_element_type=jnp.float32)
    h = h + b1_ref[...].astype(jnp.float32)
    # tanh-GELU -> EUP slot (erf would saturate the 4-wide VALU on v6e/v7x)
    h = jax.nn.gelu(h, approximate=True)
    # TODO(synk): dropout omitted (eval-mode semantics; p has no effect at inference)
    y = jnp.dot(h.astype(jnp.bfloat16), w2_ref[...],
                preferred_element_type=jnp.float32)
    y = y + b2_ref[...].astype(jnp.float32)
    # residual add in f32, cast back to I/O dtype
    o_ref[...] = (x.astype(jnp.float32) + y).astype(o_ref.dtype)


def pack_ffn_params(w1, b1, w2, b2):
    """One-time packing: block-diagonal bf16 weights for lane-dense row packing."""
    D, F = w1.shape
    P = LANE // D if (D <= LANE and LANE % D == 0) else 1
    Dp, Fp = P * D, P * F
    Fpad = _round_up(Fp, LANE)                 # pad hidden width only (zero-exact)
    eye = jnp.eye(P, dtype=jnp.float32)
    w1p = jnp.pad(jnp.kron(eye, w1.astype(jnp.float32)),
                  ((0, 0), (0, Fpad - Fp))).astype(jnp.bfloat16)
    w2p = jnp.pad(jnp.kron(eye, w2.astype(jnp.float32)),
                  ((0, Fpad - Fp), (0, 0))).astype(jnp.bfloat16)
    b1p = jnp.pad(jnp.tile(jnp.reshape(b1, (1, F)).astype(jnp.float32), (1, P)),
                  ((0, 0), (0, Fpad - Fp)))
    b2p = jnp.tile(jnp.reshape(b2, (1, D)).astype(jnp.float32), (1, P))
    return P, (w1p, b1p, w2p, b2p)


def make_encoder_layer_ffn(w1, b1, w2, b2, *, tm_max=2048):
    """Factory: packs weights once, returns a jitted [B,N,D]->[B,N,D] apply fn."""
    P, (w1p, b1p, w2p, b2p) = pack_ffn_params(w1, b1, w2, b2)

    @jax.jit
    def apply(x):
        B, N, D = x.shape
        M = B * N
        Mr = _round_up(M, P)
        x2d = x.reshape(M, D)
        if Mr != M:                            # only when M % P != 0 (<= P-1 rows)
            x2d = jnp.pad(x2d, ((0, Mr - M), (0, 0)))
        Mp, Dp = Mr // P, P * D
        xp = x2d.reshape(Mp, Dp)               # free reshape (contiguous regroup)

        TM = _choose_tm(Mp, tm_max)
        grid = (pl.cdiv(Mp, TM),)              # ragged last block masked by Pallas

        out = pl.pallas_call(
            ffn_kernel,
            out_shape=jax.ShapeDtypeStruct((Mp, Dp), x.dtype),
            grid_spec=pltpu.PrefetchScalarGridSpec(
                num_scalar_prefetch=0,
                grid=grid,
                in_specs=[
                    pl.BlockSpec((TM, Dp), lambda i: (i, 0)),       # x tile (pipelined)
                    pl.BlockSpec(w1p.shape, lambda i: (0, 0)),      # w1 (resident)
                    pl.BlockSpec(b1p.shape, lambda i: (0, 0)),      # b1 (resident)
                    pl.BlockSpec(w2p.shape, lambda i: (0, 0)),      # w2 (resident)
                    pl.BlockSpec(b2p.shape, lambda i: (0, 0)),      # b2 (resident)
                ],
                out_specs=pl.BlockSpec((TM, Dp), lambda i: (i, 0)),
            ),
            compiler_params=pltpu.CompilerParams(
                dimension_semantics=("parallel",),   # shard row tiles across TCs
                vmem_limit_bytes=32 * 1024 * 1024,   # fits v5e/v6e/v7x scoped VMEM
            ),
        )(xp, w1p, b1p, w2p, b2p)

        out = out.reshape(Mr, D)
        if Mr != M:
            out = out[:M]
        return out.reshape(B, N, D)

    return apply


def init_linear_params(key, in_dim, out_dim):
    """Deterministic init matching torch.nn.Linear default (uniform +/- 1/sqrt(in))."""
    kw, kb = jax.random.split(key)
    bound = 1.0 / (in_dim ** 0.5)
    # stored as [in, out] so the kernel does x @ W (torch stores [out, in])
    w = jax.random.uniform(kw, (in_dim, out_dim), jnp.float32, -bound, bound)
    b = jax.random.uniform(kb, (out_dim,), jnp.float32, -bound, bound)
    return w, b


if __name__ == "__main__":
    latent_dim = 32
    ffn_dim = 64
    B, N = 2, 8

    key = jax.random.PRNGKey(0)
    kx, k1, k2 = jax.random.split(key, 3)

    x = jax.random.normal(kx, (B, N, latent_dim), jnp.float32)
    w1, b1 = init_linear_params(k1, latent_dim, ffn_dim)
    w2, b2 = init_linear_params(k2, ffn_dim, latent_dim)

    ffn = make_encoder_layer_ffn(w1, b1, w2, b2)   # packing hoisted to init
    out = ffn(x)
    jax.block_until_ready(out)

    # sanity-check against the module's math (exact erf-GELU, f32); loose tol
    # accounts for bf16 MXU operands + tanh-GELU approximation in the kernel.
    ref = x + (jax.nn.gelu(x @ w1 + b1, approximate=False) @ w2 + b2)
    assert out.shape == ref.shape
    assert jnp.allclose(out, ref, atol=3e-2, rtol=0.0), "mismatch vs reference"

    print("KERNEL_OK")
</pallas_src>

<mosaic_0001>
module attributes {stable_mosaic.version = 11 : i64} {
  func.func @ffn_kernel(%arg0: i32, %arg1: memref<4x128xf32, #tpu.memory_space<vmem>>, %arg2: memref<128x256xbf16, #tpu.memory_space<vmem>>, %arg3: memref<1x256xf32, #tpu.memory_space<vmem>>, %arg4: memref<256x128xbf16, #tpu.memory_space<vmem>>, %arg5: memref<1x128xf32, #tpu.memory_space<vmem>>, %arg6: memref<4x128xf32, #tpu.memory_space<vmem>>) attributes {dimension_semantics = [#tpu.dimension_semantics<parallel>], iteration_bounds = array<i64: 1>, scalar_prefetch = 0 : i64, scratch_operands = 0 : i64, tpu.core_type = #tpu.core_type<tc>, window_params = [{transform_indices = @transform_0, window_bounds = array<i64: 4, 128>}, {pipeline_mode = #tpu.pipeline_mode<synchronous>, transform_indices = @transform_1, window_bounds = array<i64: 128, 256>}, {pipeline_mode = #tpu.pipeline_mode<synchronous>, transform_indices = @transform_2, window_bounds = array<i64: 1, 256>}, {pipeline_mode = #tpu.pipeline_mode<synchronous>, transform_indices = @transform_3, window_bounds = array<i64: 256, 128>}, {pipeline_mode = #tpu.pipeline_mode<synchronous>, transform_indices = @transform_4, window_bounds = array<i64: 1, 128>}, {transform_indices = @transform_5, window_bounds = array<i64: 4, 128>}]} {
    %c0 = arith.constant 0 : index
    %c0_0 = arith.constant 0 : index
    %0 = vector.load %arg1[%c0, %c0_0] : memref<4x128xf32, #tpu.memory_space<vmem>>, vector<4x128xf32>
    %1 = arith.truncf %0 : vector<4x128xf32> to vector<4x128xbf16>
    %c0_1 = arith.constant 0 : index
    %c0_2 = arith.constant 0 : index
    %2 = vector.load %arg2[%c0_1, %c0_2] : memref<128x256xbf16, #tpu.memory_space<vmem>>, vector<128x256xbf16>
    %cst = arith.constant dense<0.000000e+00> : vector<4x256xf32>
    %3 = tpu.matmul %1, %2, %cst {dimension_numbers = #tpu.dot_dimension_numbers<[1], [0], [0], [1], [0, 0, 1, 1], [], []>} : vector<4x128xbf16>, vector<128x256xbf16>, vector<4x256xf32> -> vector<4x256xf32>
    %c0_3 = arith.constant 0 : index
    %c0_4 = arith.constant 0 : index
    %4 = vector.load %arg3[%c0_3, %c0_4] : memref<1x256xf32, #tpu.memory_space<vmem>>, vector<1x256xf32>
    %5 = vector.broadcast %4 : vector<1x256xf32> to vector<4x256xf32>
    %6 = arith.addf %3, %5 : vector<4x256xf32>
    %7 = arith.mulf %6, %6 : vector<4x256xf32>
    %8 = arith.mulf %6, %7 : vector<4x256xf32>
    %cst_5 = arith.constant 4.471500e-02 : f32
    %9 = vector.broadcast %cst_5 : f32 to vector<4x256xf32>
    %10 = arith.mulf %9, %8 : vector<4x256xf32>
    %11 = arith.addf %6, %10 : vector<4x256xf32>
    %cst_6 = arith.constant 0.797884583 : f32
    %12 = vector.broadcast %cst_6 : f32 to vector<4x256xf32>
    %13 = arith.mulf %12, %11 : vector<4x256xf32>
    %14 = math.tanh %13 : vector<4x256xf32>
    %cst_7 = arith.constant 1.000000e+00 : f32
    %15 = vector.broadcast %cst_7 : f32 to vector<4x256xf32>
    %16 = arith.addf %15, %14 : vector<4x256xf32>
    %cst_8 = arith.constant 5.000000e-01 : f32
    %17 = vector.broadcast %cst_8 : f32 to vector<4x256xf32>
    %18 = arith.mulf %17, %16 : vector<4x256xf32>
    %19 = arith.mulf %6, %18 : vector<4x256xf32>
    %20 = arith.truncf %19 : vector<4x256xf32> to vector<4x256xbf16>
    %c0_9 = arith.constant 0 : index
    %c0_10 = arith.constant 0 : index
    %21 = vector.load %arg4[%c0_9, %c0_10] : memref<256x128xbf16, #tpu.memory_space<vmem>>, vector<256x128xbf16>
    %cst_11 = arith.constant dense<0.000000e+00> : vector<4x128xf32>
    %22 = tpu.matmul %20, %21, %cst_11 {dimension_numbers = #tpu.dot_dimension_numbers<[1], [0], [0], [1], [0, 0, 1, 1], [], []>} : vector<4x256xbf16>, vector<256x128xbf16>, vector<4x128xf32> -> vector<4x128xf32>
    %c0_12 = arith.constant 0 : index
    %c0_13 = arith.constant 0 : index
    %23 = vector.load %arg5[%c0_12, %c0_13] : memref<1x128xf32, #tpu.memory_space<vmem>>, vector<1x128xf32>
    %24 = vector.broadcast %23 : vector<1x128xf32> to vector<4x128xf32>
    %25 = arith.addf %22, %24 : vector<4x128xf32>
    %26 = arith.addf %0, %25 : vector<4x128xf32>
    %c0_14 = arith.constant 0 : index
    %c0_15 = arith.constant 0 : index
    %27 = vector.load %arg6[%c0_14, %c0_15] : memref<4x128xf32, #tpu.memory_space<vmem>>, vector<4x128xf32>
    tpu.vector_store %arg6[%c0_14, %c0_15], %26 {strides = array<i32>} : memref<4x128xf32, #tpu.memory_space<vmem>>, vector<4x128xf32>,
    return
  }
  func.func @transform_0(%arg0: i32) -> (i32, i32) {
    %c0_i32 = arith.constant 0 : i32
    %c0_i32_0 = arith.constant 0 : i32
    return %arg0, %c0_i32 : i32, i32
  }
  func.func @transform_1(%arg0: i32) -> (i32, i32) {
    %c0_i32 = arith.constant 0 : i32
    %c0_i32_0 = arith.constant 0 : i32
    %c0_i32_1 = arith.constant 0 : i32
    return %c0_i32, %c0_i32_0 : i32, i32
  }
  func.func @transform_2(%arg0: i32) -> (i32, i32) {
    %c0_i32 = arith.constant 0 : i32
    %c0_i32_0 = arith.constant 0 : i32
    %c0_i32_1 = arith.constant 0 : i32
    return %c0_i32, %c0_i32_0 : i32, i32
  }
  func.func @transform_3(%arg0: i32) -> (i32, i32) {
    %c0_i32 = arith.constant 0 : i32
    %c0_i32_0 = arith.constant 0 : i32
    %c0_i32_1 = arith.constant 0 : i32
    return %c0_i32, %c0_i32_0 : i32, i32
  }
  func.func @transform_4(%arg0: i32) -> (i32, i32) {
    %c0_i32 = arith.constant 0 : i32
    %c0_i32_0 = arith.constant 0 : i32
    %c0_i32_1 = arith.constant 0 : i32
    return %c0_i32, %c0_i32_0 : i32, i32
  }
  func.func @transform_5(%arg0: i32) -> (i32, i32) {
    %c0_i32 = arith.constant 0 : i32
    %c0_i32_0 = arith.constant 0 : i32
    return %arg0, %c0_i32 : i32, i32
  }
}

</mosaic_0001>

<bundles_post_ra>
// kernel: apply.1
= control target key start
LH: loop header
LB: loop body
LE: loop exit
PB: predicated region body
PF: predicated region fallthrough
CT: control target
= control target key end

     0   :  { %10 = vsyncpa [#allocation3], 0  ;;  %s650_s0 = inlined_call_operand.vmem [shape: f32[4,128], index: 0, kind: input, shape index: {}]   ;;  %s651_s1 = inlined_call_operand.hbm [shape: bf16[128,256], index: 1, kind: input, shape index: {}]   ;;  %s652_s2 = inlined_call_operand.vmem [shape: f32[1,256], index: 2, kind: input, shape index: {}]   ;;  %s653_s3 = inlined_call_operand.hbm [shape: bf16[256,128], index: 3, kind: input, shape index: {}]   ;;  %s654_s4 = inlined_call_operand.vmem [shape: f32[1,128], index: 4, kind: input, shape index: {}]   ;;  %s655_s5 = inlined_call_operand.vmem [shape: f32[4,128], index: 5, kind: output, shape index: {}]  }
   0x1   :  { %s18_s20 = sshll.u32 %s651_s1, 4  ;;  %s19_s20 = int_to_ptr.hbm [resolvable:$true] %s18_s20 }
   0x2   :  { %11 = vsyncpa [#allocation5], 0  ;;  %s591_s21 = smov [#allocation2]   ;;  %s33_s25 = sshll.u32 %s653_s3, 4  ;;  %s34_s25 = int_to_ptr.hbm [resolvable:$true] %s33_s25 }
   0x3   :  { %s20_s22 = sshll.u32 %s591_s21, 4  ;;  %s592_s26 = smov 128   ;;  %s21_s22 = int_to_ptr.vmem [resolvable:$true] %s20_s22 }
   0x4   :  { %s593_s27 = smov 8   ;;  %s594_s28 = smov [#allocation4]  }
   0x5   :  { %26 = dma.hbm_to_vmem [thread:$0]  %s19_s20, 2048, %s21_s22, [#allocation3], %s592_s26, %s592_s26, %s593_s27  }
   0x6   :  { %s35_s29 = sshll.u32 %s594_s28, 4  ;;  %s595_s30 = smov 64   ;;  %s36_s29 = int_to_ptr.vmem [resolvable:$true] %s35_s29 }
   0x7   :  { %s596_s6 = smov 4  }
   0x8   :  { %41 = dma.hbm_to_vmem [thread:$0]  %s34_s25, 2048, %s36_s29, [#allocation5], %s595_s30, %s595_s30, %s596_s6  }
   0x9   :  { %587 = dma.done.wait [#allocation3], 2048  }
   0xa   :  { %588 = vsyncadd [#allocation3], 4294965248 }
   0xb   :  { %589 = dma.done.wait [#allocation5], 2048  }
   0xc   :  { %590 = vsyncadd [#allocation5], 4294965248  ;;  %v426_v0 = vld [vmem:[#allocation2 + $0x70] sm:$0xf]  ;;  %v511_v1 = vld [vmem:[#allocation2 + $0x74] sm:$0xf0] }
   0xd   :  { %v510_v2 = vld [vmem:[#allocation2 + $0x74] sm:$0xf]  ;;  %v427_v3 = vor.u32 %v511_v1, %v426_v0  ;;  %v428_v4 = vld [vmem:[#allocation2 + $0x78] sm:$0xf0]  ;;  %v418_v5 = vld [vmem:[#allocation2 + $0x60] sm:$0xf] }
   0xe   :  { %v509_v6 = vld [vmem:[#allocation2 + $0x64] sm:$0xf0]  ;;  %v431_v7 = vor.u32 %v510_v2, %v428_v4  ;;  %v508_v8 = vld [vmem:[#allocation2 + $0x64] sm:$0xf]  ;;  %v420_v9 = vld [vmem:[#allocation2 + $0x68] sm:$0xf0] }
   0xf   :  { %156 = vmatpush.bf16.msra.mxu0 %v427_v3  ;;  %v419_v10 = vor.u32 %v509_v6, %v418_v5  ;;  %v423_v11 = vor.u32 %v508_v8, %v420_v9  ;;  %v410_v12 = vld [vmem:[#allocation2 + $0x50] sm:$0xf]  ;;  %v507_v13 = vld [vmem:[#allocation2 + $0x54] sm:$0xf0]  ;;  %v506_v14 = vld [vmem:[#allocation2 + $0x54] sm:$0xf] }
  0x10   :  { %169 = vmatpush.bf16.msra.mxu1 %v431_v7  ;;  %v412_v15 = vld [vmem:[#allocation2 + $0x58] sm:$0xf0]  ;;  %v411_v16 = vor.u32 %v507_v13, %v410_v12  ;;  %v402_v18 = vld [vmem:[#allocation2 + $0x40] sm:$0xf]  ;;  %v505_v19 = vld [vmem:[#allocation2 + $0x44] sm:$0xf0] }
  0x11   :  { %v415_v17 = vor.u32 %v506_v14, %v412_v15  ;;  %v504_v20 = vld [vmem:[#allocation2 + $0x44] sm:$0xf]  ;;  %v404_v21 = vld [vmem:[#allocation2 + $0x48] sm:$0xf0]  ;;  %v403_v22 = vor.u32 %v505_v19, %v402_v18  ;;  %v519_v23 = vld [vmem:[#allocation4 + $0x38] sm:$0xff] }
  0x12   :  { %v527_v24 = vld [vmem:[#allocation4 + $0x78] sm:$0xff]  ;;  %v407_v25 = vor.u32 %v504_v20, %v404_v21  ;;  %v394_v26 = vld [vmem:[#allocation2 + $0x30] sm:$0xf]  ;;  %v502_v28 = vld [vmem:[#allocation2 + $0x34] sm:$0xf]  ;;  %334 = vmatpush.bf16.msra.mxu2 %v519_v23 }
  0x13   :  { %157 = vmatpush.bf16.msra.mxu0 %v419_v10  ;;  %v503_v27 = vld [vmem:[#allocation2 + $0x34] sm:$0xf0]  ;;  %v396_v29 = vld [vmem:[#allocation2 + $0x38] sm:$0xf0]  ;;  %347 = vmatpush.bf16.msra.mxu3 %v527_v24  ;;  %v386_v32 = vld [vmem:[#allocation2 + $0x20] sm:$0xf] }
  0x14   :  { %170 = vmatpush.bf16.msra.mxu1 %v423_v11  ;;  %v395_v30 = vor.u32 %v503_v27, %v394_v26  ;;  %v399_v31 = vor.u32 %v502_v28, %v396_v29  ;;  %v501_v33 = vld [vmem:[#allocation2 + $0x24] sm:$0xf0]  ;;  %v500_v34 = vld [vmem:[#allocation2 + $0x24] sm:$0xf]  ;;  %v388_v35 = vld [vmem:[#allocation2 + $0x28] sm:$0xf0] }
  0x15   :  { %v387_v36 = vor.u32 %v501_v33, %v386_v32  ;;  %v391_v37 = vor.u32 %v500_v34, %v388_v35  ;;  %v378_v38 = vld [vmem:[#allocation2 + $0x10] sm:$0xf]  ;;  %v499_v39 = vld [vmem:[#allocation2 + $0x14] sm:$0xf0]  ;;  %v498_v40 = vld [vmem:[#allocation2 + $0x14] sm:$0xf] }
  0x16   :  { %v380_v41 = vld [vmem:[#allocation2 + $0x18] sm:$0xf0]  ;;  %v379_v42 = vor.u32 %v499_v39, %v378_v38  ;;  %v370_v44 = vld [vmem:[#allocation2] sm:$0xf]  ;;  %v497_v45 = vld [vmem:[#allocation2 + $0x4] sm:$0xf0] }
  0x17   :  { %158 = vmatpush.bf16.msra.mxu0 %v411_v16  ;;  %v383_v43 = vor.u32 %v498_v40, %v380_v41  ;;  %v496_v46 = vld [vmem:[#allocation2 + $0x4] sm:$0xf]  ;;  %v372_v47 = vld [vmem:[#allocation2 + $0x8] sm:$0xf0]  ;;  %v371_v48 = vor.u32 %v497_v45, %v370_v44  ;;  %v636_v49 = vld [vmem:[%s650_s0] sm:$0xf] }
  0x18   :  { %171 = vmatpush.bf16.msra.mxu1 %v415_v17  ;;  %v375_v50 = vor.u32 %v496_v46, %v372_v47  ;;  %v53_v51 = vpack.c.bf16 %v636_v49, %v636_v49  ;;  %v518_v52 = vld [vmem:[#allocation4 + $0x30] sm:$0xff]  ;;  %v517_v54 = vld [vmem:[#allocation4 + $0x28] sm:$0xff]  ;;  %v516_v56 = vld [vmem:[#allocation4 + $0x20] sm:$0xff] }
  0x19   :  { %v526_v53 = vld [vmem:[#allocation4 + $0x70] sm:$0xff]  ;;  %335 = vmatpush.bf16.msra.mxu2 %v518_v52  ;;  %v525_v55 = vld [vmem:[#allocation4 + $0x68] sm:$0xff]  ;;  %v524_v57 = vld [vmem:[#allocation4 + $0x60] sm:$0xff] }
  0x1a   :  { %348 = vmatpush.bf16.msra.mxu3 %v526_v53  ;;  %v515_v58 = vld [vmem:[#allocation4 + $0x18] sm:$0xff]  ;;  %v514_v60 = vld [vmem:[#allocation4 + $0x10] sm:$0xff]  ;;  %v513_v62 = vld [vmem:[#allocation4 + $0x8] sm:$0xff] }
  0x1b   :  { %159 = vmatpush.bf16.msra.mxu0 %v403_v22  ;;  %v523_v59 = vld [vmem:[#allocation4 + $0x58] sm:$0xff]  ;;  %v522_v61 = vld [vmem:[#allocation4 + $0x50] sm:$0xff]  ;;  %v521_v63 = vld [vmem:[#allocation4 + $0x48] sm:$0xff] }
  0x1c   :  { %172 = vmatpush.bf16.msra.mxu1 %v407_v25  ;;  %v512_v0 = vld [vmem:[#allocation4] sm:$0xff] }
  0x1d   :  { %336 = vmatpush.bf16.msra.mxu2 %v517_v54  ;;  %v520_v1 = vld [vmem:[#allocation4 + $0x40] sm:$0xff] }
  0x1e   :  { %349 = vmatpush.bf16.msra.mxu3 %v525_v55  ;;  %v70_v2 = vld [vmem:[%s652_s2] sm:$0x3] }
  0x1f   :  { %160 = vmatpush.bf16.msra.mxu0 %v395_v30  ;;  %v72_v3 = vperm.slane %v70_v2, 0  ;;  %v73_v4 = vperm.slane %v70_v2, 1 }
  0x20   :  { %173 = vmatpush.bf16.msra.mxu1 %v399_v31  ;;  %v534_v31 = vld [vmem:[%s654_s4] ss:$0 sm:$0xff] }
  0x21   :  { %337 = vmatpush.bf16.msra.mxu2 %v516_v56 }
  0x22   :  { %350 = vmatpush.bf16.msra.mxu3 %v524_v57 }
  0x23   :  { %161 = vmatpush.bf16.msra.mxu0 %v387_v36 }
  0x24   :  { %174 = vmatpush.bf16.msra.mxu1 %v391_v37 }
  0x25   :  { %338 = vmatpush.bf16.msra.mxu2 %v515_v58 }
  0x26   :  { %351 = vmatpush.bf16.msra.mxu3 %v523_v59 }
  0x27   :  { %162 = vmatpush.bf16.msra.mxu0 %v379_v42 }
  0x28   :  { %175 = vmatpush.bf16.msra.mxu1 %v383_v43 }
  0x29   :  { %339 = vmatpush.bf16.msra.mxu2 %v514_v60 }
  0x2a   :  { %352 = vmatpush.bf16.msra.mxu3 %v522_v61 }
  0x2b   :  { %163 = vmatpush.bf16.msra.mxu0 %v371_v48 }
  0x2c   :  { %176 = vmatpush.bf16.msra.mxu1 %v375_v50 }
  0x2d   :  { %340 = vmatpush.bf16.msra.mxu2 %v513_v62 }
  0x2e   :  { %164 = vmatmul.bf16.vlgmr.msra.gmra.mxu0 %v53_v51  ;;  %353 = vmatpush.bf16.msra.mxu3 %v521_v63 }
  0x2f   :  { %177 = vmatmul.bf16.vlgmr.msra.gmra.mxu1 %v53_v51 }
  0x31   :  { %341 = vmatpush.bf16.msra.mxu2 %v512_v0 }
  0x32   :  { %354 = vmatpush.bf16.msra.mxu3 %v520_v1 }
  0xab   :  { %v165_v5 = vpop.f32.mrf.mxu0 }
  0xac   :  { %v166_v6 = vadd.f32 %v165_v5, %v72_v3  ;;  %v178_v7 = vpop.f32.mrf.mxu1 }
  0xad   :  { %v179_v8 = vadd.f32 %v178_v7, %v73_v4 }
  0xae   :  { %v182_v9 = vmul.f32 %v166_v6, %v166_v6 }
  0xaf   :  { %v183_v10 = vmul.f32 %v179_v8, %v179_v8 }
  0xb0   :  { %v184_v11 = vmul.f32 %v182_v9, %v166_v6 }
  0xb1   :  { %v185_v12 = vmul.f32 %v183_v10, %v179_v8 }
  0xb2   :  { %v186_v13 = vmul.f32 0.044715, %v184_v11 }
  0xb3   :  { %v187_v14 = vmul.f32 0.044715, %v185_v12  ;;  %v167_v15 = vpop.f32.mrf.mxu0 }
  0xb4   :  { %v180_v16 = vpop.f32.mrf.mxu1  ;;  %v188_v17 = vadd.f32 %v186_v13, %v166_v6 }
  0xb5   :  { %v189_v18 = vadd.f32 %v187_v14, %v179_v8 }
  0xb6   :  { %v190_v19 = vmul.f32 0.7978846, %v188_v17 }
  0xb7   :  { %v191_v20 = vmul.f32 0.7978846, %v189_v18 }
  0xb8   :  { %535 = vtanh.f32 %v190_v19 }
  0xb9   :  { %537 = vtanh.f32 %v191_v20 }
  0xbe   :  { %v536_v21 = vpop.eup %535 }
  0xbf   :  { %v538_v22 = vpop.eup %537  ;;  %v194_v23 = vadd.f32 1.0, %v536_v21 }
  0xc0   :  { %v195_v24 = vadd.f32 1.0, %v538_v22 }
  0xc1   :  { %v196_v25 = vmul.f32 0.5, %v194_v23 }
  0xc2   :  { %v197_v26 = vmul.f32 0.5, %v195_v24 }
  0xc3   :  { %v198_v27 = vmul.f32 %v196_v25, %v166_v6 }
  0xc4   :  { %v199_v28 = vmul.f32 %v197_v26, %v179_v8 }
  0xc5   :  { %v200_v29 = vpack.c.bf16 %v198_v27, %v198_v27 }
  0xc6   :  { %v201_v30 = vpack.c.bf16 %v199_v28, %v199_v28 }
  0xc7   :  { %342 = vmatmul.bf16.vlgmr.msra.gmra.mxu2 %v200_v29 }
  0xc8   :  { %355 = vmatmul.bf16.vlgmr.msra.gmra.mxu3 %v201_v30 }
 0x14a   :  { %v343_v32 = vpop.f32.mrf.mxu2 }
 0x14b   :  { %v344_v33 = vadd.f32 %v534_v31, %v343_v32  ;;  %v356_v34 = vpop.f32.mrf.mxu3 }
 0x14d   :  { %v357_v35 = vadd.f32 %v356_v34, %v344_v33 }
 0x14f   :  { %v360_v36 = vadd.f32 %v357_v35, %v636_v49 }
 0x151   :  { %361 = vst [vmem:[%s655_s5] sm:$0xf] %v360_v36 }
 0x152   :  { %v345_v37 = vpop.f32.mrf.mxu2 }
 0x153   :  { %v358_v38 = vpop.f32.mrf.mxu3 }
 0x154   :  { %366 = vsyncpa [#allocation3], 1 }
 0x155   :  { %367 = vsyncpa [#allocation5], 1 }

</bundles_post_ra>
